<compile_context>
chip_gen: v7x
topology: tpu7x:2x2x1
jax: 0.10.0
libtpu: 0.0.40
codegen_flags: <defaults>
</compile_context>

<pallas_src>
import functools
import math

import jax
import jax.numpy as jnp
from jax.experimental import pallas as pl
from jax.experimental.pallas import tpu as pltpu


# ---------------------------------------------------------------------------
# Fused linear (+ optional tanh on input or output) kernel, M/N tiled.
# ---------------------------------------------------------------------------
def _linear_kernel(x_ref, w_ref, b_ref, o_ref, *, tanh_in, tanh_out):
    x = x_ref[...]
    if tanh_in:
        x = jnp.tanh(x)
    y = jnp.dot(x, w_ref[...], preferred_element_type=jnp.float32) + b_ref[...]
    if tanh_out:
        y = jnp.tanh(y)
    o_ref[...] = y.astype(o_ref.dtype)


def linear(x, w, b, *, tanh_in=False, tanh_out=False, block_m=512, block_n=1024):
    """y = [tanh](([tanh]x) @ w + b).  x: (M, K), w: (K, N), b: (N,)."""
    m, k = x.shape
    n = w.shape[1]
    bm = min(m, block_m)
    bn = min(n, block_n)
    grid = (pl.cdiv(m, bm), pl.cdiv(n, bn))
    return pl.pallas_call(
        functools.partial(_linear_kernel, tanh_in=tanh_in, tanh_out=tanh_out),
        out_shape=jax.ShapeDtypeStruct((m, n), jnp.float32),
        grid=grid,
        in_specs=[
            pl.BlockSpec((bm, k), lambda i, j: (i, 0)),
            pl.BlockSpec((k, bn), lambda i, j: (0, j)),
            pl.BlockSpec((1, bn), lambda i, j: (0, j)),
        ],
        out_specs=pl.BlockSpec((bm, bn), lambda i, j: (i, j)),
        compiler_params=pltpu.CompilerParams(
            dimension_semantics=("parallel", "parallel")),
    )(x, w, b.reshape(1, n))


# ---------------------------------------------------------------------------
# One bidirectional GRU layer in a single (gridless) kernel.
#   gi:  (S, B, 6H)  precomputed W_ih x + b_ih (+ b_hh for r/z gates);
#        [:, :, :3H] is the forward direction, [:, :, 3H:] the backward one.
#   h0:  (2, B, H)   initial hidden for (fwd, bwd)
#   w_hh_{f,b}: (H, 3H)   b_hn_{f,b}: (1, H)  (hidden bias of the n-gate only)
#   out: (S, B, 2H)  forward half in [..., :H], backward in [..., H:]
# ---------------------------------------------------------------------------
def _bigru_layer_kernel(gi_ref, h0_ref, whh_f_ref, whh_b_ref,
                        bhn_f_ref, bhn_b_ref, out_ref,
                        *, hidden, seq_len, unroll):
    H = hidden
    batch = out_ref.shape[1]
    # Hoisted once (tiny); JAX does not CSE broadcast_in_dim inside the loop.
    bhn_f = jnp.broadcast_to(bhn_f_ref[...], (batch, H))
    bhn_b = jnp.broadcast_to(bhn_b_ref[...], (batch, H))

    def cell(gi, gh, bhn, h):
        # gi already holds W_ih x + b_ih (+ b_hr / b_hz folded in).
        rz = jax.nn.sigmoid(gi[:, :2 * H] + gh[:, :2 * H])   # fused r/z sigmoid
        r = rz[:, :H]
        z = rz[:, H:]
        n = jnp.tanh(gi[:, 2 * H:] + r * (gh[:, 2 * H:] + bhn))
        return (1.0 - z) * n + z * h

    def body(i, carry):
        h_f, h_b = carry
        t_b = seq_len - 1 - i
        # Only the h @ W_hh matmuls remain in the serial chain; the two
        # directions are independent and interleave on the MXU.  W_hh is read
        # from its Ref inside the body (no big live values across the loop).
        gh_f = jnp.dot(h_f, whh_f_ref[...], preferred_element_type=jnp.float32)
        gh_b = jnp.dot(h_b, whh_b_ref[...], preferred_element_type=jnp.float32)
        h_f = cell(gi_ref[i, :, pl.ds(0, 3 * H)], gh_f, bhn_f, h_f)
        h_b = cell(gi_ref[t_b, :, pl.ds(3 * H, 3 * H)], gh_b, bhn_b, h_b)
        # Direct stores into the output halves (no scratch, no concat).
        out_ref[i, :, pl.ds(0, H)] = h_f
        out_ref[t_b, :, pl.ds(H, H)] = h_b
        return (h_f, h_b)

    jax.lax.fori_loop(0, seq_len, body, (h0_ref[0], h0_ref[1]), unroll=unroll)


def bigru_layer(gi, h0, w_hh_f, w_hh_b, b_hn_f, b_hn_b, *, unroll=4):
    seq_len, batch, six_h = gi.shape
    hidden = six_h // 6
    vmem = pl.BlockSpec(memory_space=pltpu.MemorySpace.VMEM)

    # Explicit VMEM budget for the gridless call (all operands resident,
    # no pipelining).  Cap at 64 MiB so the limit is valid on v7x too.
    out_elems = seq_len * batch * 2 * hidden
    resident_bytes = 4 * (gi.size + out_elems + h0.size + w_hh_f.size
                          + w_hh_b.size + b_hn_f.size + b_hn_b.size)
    vmem_limit = int(min(64 << 20, max(2 * resident_bytes + (1 << 20), 16 << 20)))

    return pl.pallas_call(
        functools.partial(_bigru_layer_kernel, hidden=hidden, seq_len=seq_len,
                          unroll=max(1, min(unroll, seq_len))),
        out_shape=jax.ShapeDtypeStruct((seq_len, batch, 2 * hidden), jnp.float32),
        in_specs=[vmem] * 6,
        out_specs=vmem,
        compiler_params=pltpu.CompilerParams(vmem_limit_bytes=vmem_limit),
    )(gi, h0, w_hh_f, w_hh_b, b_hn_f, b_hn_b)


# ---------------------------------------------------------------------------
# Parameter construction (deterministic, synthetic), stored in fused layout.
# ---------------------------------------------------------------------------
def init_params(key, vocab_size, embed_size, hidden_size, num_layers):
    def unif(k, shape, scale):
        return jax.random.uniform(k, shape, jnp.float32, -scale, scale)

    H = hidden_size
    s_emb = 1.0 / math.sqrt(embed_size)
    s_h = 1.0 / math.sqrt(H)
    s_2h = 1.0 / math.sqrt(2 * H)

    keys = iter(jax.random.split(key, 8 + 8 * num_layers))
    params = {
        "hidden_size": H,
        "num_layers": num_layers,
        "embedding": jax.random.normal(next(keys), (vocab_size, embed_size),
                                       jnp.float32),
        "e2h_w": unif(next(keys), (embed_size, H), s_emb),
        "e2h_b": unif(next(keys), (H,), s_emb),
        # h2h exists in the PyTorch module but is unused by forward(); kept
        # only for parameter-shape parity.
        "h2h_w": unif(next(keys), (2 * H, H), s_2h),
        "h2h_b": unif(next(keys), (H,), s_2h),
        "h2v_w": unif(next(keys), (2 * H, vocab_size), s_2h),
        "h2v_b": unif(next(keys), (vocab_size,), s_2h),
        "gru": [],
    }

    def fold_bias(b_ih, b_hh):
        # b_ih for all gates; b_hh only for r/z (n-gate hidden bias must stay
        # inside the cell because it is multiplied by r, per PyTorch GRU).
        return jnp.concatenate([b_ih[:2 * H] + b_hh[:2 * H], b_ih[2 * H:]])

    for layer in range(num_layers):
        in_dim = H if layer == 0 else 2 * H
        raw = []
        for _direction in range(2):
            w_ih = unif(next(keys), (in_dim, 3 * H), s_h)
            w_hh = unif(next(keys), (H, 3 * H), s_h)
            b_ih = unif(next(keys), (3 * H,), s_h)
            b_hh = unif(next(keys), (3 * H,), s_h)
            raw.append((w_ih, w_hh, b_ih, b_hh))
        (wif, whf, bif, bhf), (wib, whb, bib, bhb) = raw
        params["gru"].append({
            "w_ih_cat": jnp.concatenate([wif, wib], axis=1),      # (in_dim, 6H)
            "b_ih_cat": jnp.concatenate([fold_bias(bif, bhf),
                                         fold_bias(bib, bhb)]),   # (6H,)
            "w_hh_f": whf, "w_hh_b": whb,
            "b_hn_f": bhf[2 * H:].reshape(1, H),
            "b_hn_b": bhb[2 * H:].reshape(1, H),
        })
    return params


# ---------------------------------------------------------------------------
# Forward pass (matches ReorderingEncoder.forward semantics)
# ---------------------------------------------------------------------------
def reordering_encoder_forward(params, xs, fhidden):
    seq_len, batch = xs.shape
    H = params["hidden_size"]
    num_layers = params["num_layers"]
    assert num_layers >= 1, "ReorderingEncoder requires num_layers >= 1"

    # embedding gather: plain-JAX glue (gather); projections run in Pallas.
    # TODO(synk): could be fused into the e2h kernel via scalar-prefetch row
    # gather for large embed/seq sizes.
    emb = jnp.take(params["embedding"], xs, axis=0)                   # (S, B, E)
    embed_size = emb.shape[-1]

    # embedded = tanh(e2h(embedding(xs))) — kept flattened as (S*B, H).
    layer_in = linear(emb.reshape(seq_len * batch, embed_size),
                      params["e2h_w"], params["e2h_b"], tanh_out=True)

    out = None
    for layer in range(num_layers):
        lp = params["gru"][layer]
        # Hoisted input->hidden projection for BOTH directions in one matmul;
        # the fwd/bwd halves are sliced inside the recurrence kernel (no XLA
        # slice copies of the gi tensor).
        gi_all = linear(layer_in, lp["w_ih_cat"], lp["b_ih_cat"])     # (S*B, 6H)
        gi_all = gi_all.reshape(seq_len, batch, 6 * H)                # free view
        h0 = fhidden[2 * layer:2 * layer + 2]                         # (2, B, H)
        out = bigru_layer(gi_all, h0, lp["w_hh_f"], lp["w_hh_b"],
                          lp["b_hn_f"], lp["b_hn_b"])                 # (S, B, 2H)
        layer_in = out.reshape(seq_len * batch, 2 * H)

    fout = out                                                        # (S, B, 2H)

    # preds = h2v(tanh(fout))
    preds = linear(layer_in, params["h2v_w"], params["h2v_b"], tanh_in=True)
    preds = preds.reshape(seq_len, batch, -1)

    fout_view = fout.reshape(seq_len, batch, 2, H)
    return preds, fout_view


# ---------------------------------------------------------------------------
if __name__ == "__main__":
    vocab_size, embed_size, hidden_size, num_layers = 50, 16, 32, 2
    seq_len, batch = 8, 2

    key = jax.random.PRNGKey(0)
    k_param, k_xs = jax.random.split(key)

    params = init_params(k_param, vocab_size, embed_size, hidden_size, num_layers)
    xs = jax.random.randint(k_xs, (seq_len, batch), 0, vocab_size, jnp.int32)
    fhidden = jnp.zeros((num_layers * 2, batch, hidden_size), jnp.float32)

    preds, fout = reordering_encoder_forward(params, xs, fhidden)
    preds = jax.block_until_ready(preds)
    fout = jax.block_until_ready(fout)

    assert preds.shape == (seq_len, batch, vocab_size)
    assert fout.shape == (seq_len, batch, 2, hidden_size)
    print("KERNEL_OK")
</pallas_src>

<mosaic_0001>
module attributes {stable_mosaic.version = 11 : i64} {
  func.func @_linear_kernel(%arg0: i32, %arg1: i32, %arg2: memref<16x16xf32, #tpu.memory_space<vmem>>, %arg3: memref<16x32xf32, #tpu.memory_space<vmem>>, %arg4: memref<1x32xf32, #tpu.memory_space<vmem>>, %arg5: memref<16x32xf32, #tpu.memory_space<vmem>>) attributes {dimension_semantics = [#tpu.dimension_semantics<parallel>, #tpu.dimension_semantics<parallel>], iteration_bounds = array<i64: 1, 1>, scalar_prefetch = 0 : i64, scratch_operands = 0 : i64, tpu.core_type = #tpu.core_type<tc>, window_params = [{transform_indices = @transform_0, window_bounds = array<i64: 16, 16>}, {transform_indices = @transform_1, window_bounds = array<i64: 16, 32>}, {transform_indices = @transform_2, window_bounds = array<i64: 1, 32>}, {transform_indices = @transform_3, window_bounds = array<i64: 16, 32>}]} {
    %c0 = arith.constant 0 : index
    %c0_0 = arith.constant 0 : index
    %0 = vector.load %arg2[%c0, %c0_0] : memref<16x16xf32, #tpu.memory_space<vmem>>, vector<16x16xf32>
    %c0_1 = arith.constant 0 : index
    %c0_2 = arith.constant 0 : index
    %1 = vector.load %arg3[%c0_1, %c0_2] : memref<16x32xf32, #tpu.memory_space<vmem>>, vector<16x32xf32>
    %cst = arith.constant dense<0.000000e+00> : vector<16x32xf32>
    %2 = tpu.matmul %0, %1, %cst {dimension_numbers = #tpu.dot_dimension_numbers<[1], [0], [0], [1], [0, 0, 1, 1], [], []>} : vector<16x16xf32>, vector<16x32xf32>, vector<16x32xf32> -> vector<16x32xf32>
    %c0_3 = arith.constant 0 : index
    %c0_4 = arith.constant 0 : index
    %3 = vector.load %arg4[%c0_3, %c0_4] : memref<1x32xf32, #tpu.memory_space<vmem>>, vector<1x32xf32>
    %4 = vector.broadcast %3 : vector<1x32xf32> to vector<16x32xf32>
    %5 = arith.addf %2, %4 : vector<16x32xf32>
    %6 = math.tanh %5 : vector<16x32xf32>
    %c0_5 = arith.constant 0 : index
    %c0_6 = arith.constant 0 : index
    %7 = vector.load %arg5[%c0_5, %c0_6] : memref<16x32xf32, #tpu.memory_space<vmem>>, vector<16x32xf32>
    tpu.vector_store %arg5[%c0_5, %c0_6], %6 {strides = array<i32>} : memref<16x32xf32, #tpu.memory_space<vmem>>, vector<16x32xf32>,
    return
  }
  func.func @transform_0(%arg0: i32, %arg1: i32) -> (i32, i32) {
    %c0_i32 = arith.constant 0 : i32
    %c0_i32_0 = arith.constant 0 : i32
    return %arg0, %c0_i32 : i32, i32
  }
  func.func @transform_1(%arg0: i32, %arg1: i32) -> (i32, i32) {
    %c0_i32 = arith.constant 0 : i32
    %c0_i32_0 = arith.constant 0 : i32
    return %c0_i32, %arg1 : i32, i32
  }
  func.func @transform_2(%arg0: i32, %arg1: i32) -> (i32, i32) {
    %c0_i32 = arith.constant 0 : i32
    %c0_i32_0 = arith.constant 0 : i32
    return %c0_i32, %arg1 : i32, i32
  }
  func.func @transform_3(%arg0: i32, %arg1: i32) -> (i32, i32) {
    %c0_i32 = arith.constant 0 : i32
    return %arg0, %arg1 : i32, i32
  }
}

</mosaic_0001>

<bundles_post_ra>
// kernel: tpu_custom_call.1
= control target key start
LH: loop header
LB: loop body
LE: loop exit
PB: predicated region body
PF: predicated region fallthrough
CT: control target
= control target key end

     0   :  { %8 = vsyncpa [#allocation3], 0  ;;  %s331_s0 = inlined_call_operand.hbm [shape: f32[16,16], index: 0, kind: input, shape index: {}]   ;;  %s332_s1 = inlined_call_operand.hbm [shape: f32[16,32], index: 1, kind: input, shape index: {}]   ;;  %s333_s2 = inlined_call_operand.vmem [shape: f32[1,32], index: 2, kind: input, shape index: {}]   ;;  %s334_s3 = inlined_call_operand.hbm [shape: f32[16,32], index: 3, kind: output, shape index: {}]  }
   0x1   :  { %9 = vsyncpa [#allocation6], 0 }
   0x2   :  { %10 = vsyncpa [#allocation4], 0  ;;  %s258_s12 = smov [#allocation2]   ;;  %s186_s16 = scalar_lea.hbm %s331_s0, 256 }
   0x3   :  { %s16_s13 = sshll.u32 %s258_s12, 4  ;;  %p187_p0 = scmp.ne.s32.totalorder %s331_s0, %s186_s16  ;;  %s17_s13 = int_to_ptr.vmem [resolvable:$true] %s16_s13 }
   0x4   :  { %p190_p1 = scmp.lt.u32.totalorder %s186_s16, %s331_s0 }
   0x6   :  { %p192_p2 = pnand %p190_p1, %p187_p0 }
   0x8   :  { %195 = shalt.err (!%p192_p2)
}
   0x9   :  { %s196_s21 = scalar_lea.vmem %s17_s13, 256  ;;  %p201_p4 = scmp.lt.s32.totalorder %s17_s13, %s17_s13 }
   0xa   :  { %p197_p3 = scmp.ne.s32.totalorder %s17_s13, %s196_s21  ;;  %p202_p5 = scmp.lt.s32.totalorder %s196_s21, %s196_s21 }
   0xc   :  { %p203_p6 = por %p202_p5, %p201_p4 }
   0xe   :  { %p204_p7 = pnand %p203_p6, %p197_p3 }
  0x10   :  { %207 = shalt.err (!%p204_p7)
}
  0x11   :  { %s259_s22 = smov 128   ;;  %s260_s23 = smov 8  }
  0x12   :  { %22 = dma.hbm_to_vmem [thread:$0]  %s331_s0, 256, %s17_s13, [#allocation3], %s259_s22, %s259_s22, %s260_s23  }
  0x13   :  { %s261_s26 = smov [#allocation5]   ;;  %s208_s30 = scalar_lea.hbm %s332_s1, 256 }
  0x14   :  { %s28_s27 = sshll.u32 %s261_s26, 4  ;;  %p209_p8 = scmp.ne.s32.totalorder %s332_s1, %s208_s30  ;;  %s29_s27 = int_to_ptr.vmem [resolvable:$true] %s28_s27 }
  0x15   :  { %p212_p9 = scmp.lt.u32.totalorder %s208_s30, %s332_s1 }
  0x17   :  { %p214_p10 = pnand %p212_p9, %p209_p8 }
  0x19   :  { %217 = shalt.err (!%p214_p10)
}
  0x1a   :  { %s218_s8 = scalar_lea.vmem %s29_s27, 256  ;;  %p223_p12 = scmp.lt.s32.totalorder %s29_s27, %s29_s27 }
  0x1b   :  { %p219_p11 = scmp.ne.s32.totalorder %s29_s27, %s218_s8  ;;  %p224_p13 = scmp.lt.s32.totalorder %s218_s8, %s218_s8 }
  0x1d   :  { %p225_p0 = por %p224_p13, %p223_p12 }
  0x1f   :  { %p226_p1 = pnand %p225_p0, %p219_p11 }
  0x21   :  { %229 = shalt.err (!%p226_p1)
}
  0x22   :  { %34 = dma.hbm_to_vmem [thread:$0]  %s332_s1, 256, %s29_s27, [#allocation6], %s259_s22, %s259_s22, %s260_s23  }
  0x23   :  { %252 = dma.done.wait [#allocation3], 256  }
  0x24   :  { %253 = vsyncadd [#allocation3], 4294967040 }
  0x25   :  { %254 = dma.done.wait [#allocation6], 256  }
  0x26   :  { %255 = vsyncadd [#allocation6], 4294967040  ;;  %vm54_vm0 = vcmask 130048   ;;  %v45_v0 = vld [vmem:[#allocation5] sm:$0xff]  ;;  %v46_v1 = vld [vmem:[#allocation5 + $0x8] sm:$0xff]  ;;  %s262_s1 = smov [#allocation7]  }
  0x27   :  { %v43_v2 = vld [vmem:[#allocation2] sm:$0xff]  ;;  %v173_v3 = vpack.c.bf16 %v46_v1, %v45_v0  ;;  %v44_v4 = vld [vmem:[#allocation2 + $0x8] sm:$0xff]  ;;  %s146_s12 = sshll.u32 %s262_s1, 4  ;;  %vm138_vm1 = vcmask 261120   ;;  %s147_s12 = int_to_ptr.vmem [resolvable:$true] %s146_s12 }
  0x28   :  { %170 = vmatprep.mubr.msk.f32.mxu0 %vm54_vm0, %v43_v2  ;;  %v159_v5 = vld [vmem:[%s333_s2] ss:$0 sm:$0xff]  ;;  %s230_s13 = scalar_lea.vmem %s147_s12, 256  ;;  %p235_p3 = scmp.lt.s32.totalorder %s147_s12, %s147_s12 }
  0x29   :  { %174 = vmatprep.subr.bf16.mxu0 %v173_v3  ;;  %p231_p2 = scmp.ne.s32.totalorder %s147_s12, %s230_s13  ;;  %p236_p4 = scmp.lt.s32.totalorder %s230_s13, %s230_s13 }
  0x2a   :  { %176 = vmatpush3.bf16.msra.mxu0 %v173_v3 }
  0x2b   :  { %p237_p5 = por %p236_p4, %p235_p3 }
  0x2d   :  { %171 = vmatmul.mubr.msk.f32.vlgmr.msra.gmra.mrb[0].mxu0 %vm54_vm0, %v44_v4  ;;  %p238_p6 = pnand %p237_p5, %p231_p2 }
 0x100   :  { %v172_v6 = vpop.f32.mrb[0].mxu0 }
 0x101   :  { %v133_v7 = vadd.f32 %v172_v6, %v159_v5  ;;  %v127_v8 = vpop.f32.mrb[1].mxu0 }
 0x102   :  { %v128_v9 = vadd.f32 %v159_v5, %v127_v8 }
 0x103   :  { %182 = vtanh.f32 %v133_v7 }
 0x104   :  { %184 = vtanh.f32 %v128_v9 }
 0x10d   :  { %v183_v10 = vpop.eup %182 }
 0x10e   :  { %v185_v11 = vpop.eup %184  ;;  %140 = vst.msk [vmem:[#allocation7 + $0x8] sm:$0xff] %vm138_vm1, %v183_v10 }
 0x10f   :  { %139 = vst.msk [vmem:[#allocation7] sm:$0xff] %vm138_vm1, %v185_v11 }
 0x110   :  { %241 = shalt.err (!%p238_p6)
}
 0x111   :  { %s242_s15 = scalar_lea.hbm %s334_s3, 256 }
 0x112   :  { %p243_p7 = scmp.ne.s32.totalorder %s334_s3, %s242_s15  ;;  %p246_p8 = scmp.lt.u32.totalorder %s242_s15, %s334_s3 }
 0x114   :  { %p248_p9 = pnand %p246_p8, %p243_p7 }
 0x116   :  { %251 = shalt.err (!%p248_p9)
}
 0x117   :  { %152 = dma.vmem_to_hbm [thread:$0]  %s147_s12, 256, %s334_s3, [#allocation4], %s259_s22, %s259_s22, %s260_s23  }
 0x118   :  { %256 = dma.done.wait [#allocation4], 256  }
 0x119   :  { %257 = vsyncadd [#allocation4], 4294967040 }
 0x11a   :  { %156 = vsyncpa [#allocation3], 1 }
 0x11b   :  { %157 = vsyncpa [#allocation6], 1 }
 0x11c   :  { %158 = vsyncpa [#allocation4], 1 }

</bundles_post_ra>
